<compile_context>
chip_gen: v6e
topology: v6e:2x2x1
jax: 0.10.0
libtpu: 0.0.40
codegen_flags: <defaults>
</compile_context>

<pallas_src>
import jax
import jax.numpy as jnp
import numpy as np
from jax.experimental import pallas as pl
from jax.experimental.pallas import tpu as pltpu

LANES = 128


def overprojnet_xs_kernel(x_ref, w1_ref, b1_ref, w2_ref, b2_ref, o_ref):
    # x_ref : VMEM (tb, 128)          -- 32 samples per row (4 features each)
    # w1_ref: VMEM (128, 32*hid)      -- kron(I_32, w1.T), grid-resident
    # b1_ref: VMEM (1, 32*hid)        -- tile(b1, 32), grid-resident
    # w2_ref: VMEM (32*hid, 32*out)   -- kron(I_32, w2.T), grid-resident
    # b2_ref: VMEM (1, 32*out)        -- tile(b2, 32), grid-resident
    # o_ref : VMEM (tb, 32*out)       -- 32 samples per row
    x = x_ref[...]
    # Linear1 on the MXU: (tb, 128) @ (128, 32*hid).
    h = jnp.dot(x, w1_ref[...], preferred_element_type=jnp.float32)
    # Bias + ReLU on dense slabs (VPU).
    h = jnp.maximum(h + b1_ref[...], 0.0)
    # Linear2 on the MXU: (tb, 32*hid) @ (32*hid, 32*out).
    y = jnp.dot(h, w2_ref[...], preferred_element_type=jnp.float32)
    o_ref[...] = (y + b2_ref[...]).astype(o_ref.dtype)


def overprojnet_xs_forward(x, w1, b1, w2, b2, *, block_rows=2048):
    """OverProjNetXS forward.

    x: (B, 4) f32, w1: (16, 4), b1: (16,), w2: (out, 16), b2: (out,).
    Returns (B, out) = linear2(relu(linear1(x))).
    """
    B, in_dim = x.shape
    hid = w1.shape[0]
    out_dim = w2.shape[0]
    dtype = x.dtype
    assert LANES % in_dim == 0, "in_dim must divide 128 for lane packing"
    pack = LANES // in_dim                      # samples per 128-lane row (32)

    # Only padding ever done: <pack samples so B becomes a multiple of `pack`.
    b_pad = ((B + pack - 1) // pack) * pack
    x_p = x if b_pad == B else jnp.pad(x, ((0, b_pad - B), (0, 0)))
    rows = b_pad // pack
    x_packed = x_p.reshape(rows, LANES)         # free row-major bitcast

    # Tiny block-diagonal packed weights (<= ~320 KiB), VMEM-resident.
    eye = jnp.eye(pack, dtype=dtype)
    w1p = jnp.kron(eye, w1.T.astype(dtype))                       # (128, pack*hid)
    w2p = jnp.kron(eye, w2.T.astype(dtype))                       # (pack*hid, pack*out)
    b1p = jnp.tile(b1.astype(dtype), pack).reshape(1, pack * hid)
    b2p = jnp.tile(b2.astype(dtype), pack).reshape(1, pack * out_dim)

    tb = min(block_rows, rows)                  # ragged last block is clipped
    grid = (pl.cdiv(rows, tb),)

    # Real traffic: read x, write y, plus the resident packed params once.
    flops = 2 * B * (in_dim * hid + hid * out_dim)
    bytes_accessed = 4 * (B * in_dim + B * out_dim
                          + w1p.size + b1p.size + w2p.size + b2p.size)

    resident = lambda i: (0, 0)                 # constant block -> stays in VMEM

    out_packed = pl.pallas_call(
        overprojnet_xs_kernel,
        out_shape=jax.ShapeDtypeStruct((rows, pack * out_dim), dtype),
        grid=grid,
        in_specs=[
            pl.BlockSpec((tb, LANES), lambda i: (i, 0)),            # x (blocked)
            pl.BlockSpec((LANES, pack * hid), resident),            # w1 packed
            pl.BlockSpec((1, pack * hid), resident),                # b1 packed
            pl.BlockSpec((pack * hid, pack * out_dim), resident),   # w2 packed
            pl.BlockSpec((1, pack * out_dim), resident),            # b2 packed
        ],
        out_specs=pl.BlockSpec((tb, pack * out_dim), lambda i: (i, 0)),
        compiler_params=pltpu.CompilerParams(
            dimension_semantics=("parallel",),   # megacore; no-op on 1-TC chips
            vmem_limit_bytes=32 * 1024 * 1024,   # ~13 MiB used at tb=2048; v7x-safe
        ),
        cost_estimate=pl.CostEstimate(
            flops=flops, transcendentals=0, bytes_accessed=bytes_accessed),
    )(x_packed, w1p, b1p, w2p, b2p)

    # Free reshape back to per-sample layout; drop the <pack padded samples.
    out = out_packed.reshape(b_pad, out_dim)
    return out if b_pad == B else out[:B]


if __name__ == "__main__":
    key = jax.random.PRNGKey(0)
    k_x, k_w1, k_b1, k_w2, k_b2 = jax.random.split(key, 5)

    # Small shapes consistent with the module; B deliberately NOT a multiple of
    # 32 so the tail-pad + ragged-last-block paths are exercised.
    B = 900
    IN, HID, OUT = 4, 16, 1          # projection_axis = x -> linear2 has 1 output

    x = jax.random.normal(k_x, (B, IN), dtype=jnp.float32)

    # Deterministic synthetic parameters (normal, std=0.01, like init_with_normal).
    CONSTANT_STD = 0.01
    w1 = CONSTANT_STD * jax.random.normal(k_w1, (HID, IN), dtype=jnp.float32)
    b1 = CONSTANT_STD * jax.random.normal(k_b1, (HID,), dtype=jnp.float32)
    w2 = CONSTANT_STD * jax.random.normal(k_w2, (OUT, HID), dtype=jnp.float32)
    b2 = CONSTANT_STD * jax.random.normal(k_b2, (OUT,), dtype=jnp.float32)

    # Multi-step ragged grid (block_rows=8 over 29 packed rows) ...
    out_small = jax.block_until_ready(
        overprojnet_xs_forward(x, w1, b1, w2, b2, block_rows=8))
    # ... and the default single-block path (block clamps to full extent).
    out_default = jax.block_until_ready(
        overprojnet_xs_forward(x, w1, b1, w2, b2))

    # High-precision reference on the host.
    xn = np.asarray(x, dtype=np.float64)
    ref = np.maximum(xn @ np.asarray(w1, np.float64).T + np.asarray(b1, np.float64), 0.0)
    ref = ref @ np.asarray(w2, np.float64).T + np.asarray(b2, np.float64)

    assert out_small.shape == (B, OUT)
    assert out_default.shape == (B, OUT)
    assert np.allclose(np.asarray(out_small), ref, atol=5e-5, rtol=5e-3)
    assert np.allclose(np.asarray(out_default), ref, atol=5e-5, rtol=5e-3)

    print("KERNEL_OK")
</pallas_src>

<mosaic_0001>
module attributes {stable_mosaic.version = 11 : i64} {
  func.func @overprojnet_xs_kernel(%arg0: i32, %arg1: memref<8x128xf32, #tpu.memory_space<vmem>>, %arg2: memref<128x512xf32, #tpu.memory_space<vmem>>, %arg3: memref<1x512xf32, #tpu.memory_space<vmem>>, %arg4: memref<512x32xf32, #tpu.memory_space<vmem>>, %arg5: memref<1x32xf32, #tpu.memory_space<vmem>>, %arg6: memref<8x32xf32, #tpu.memory_space<vmem>>) attributes {dimension_semantics = [#tpu.dimension_semantics<parallel>], iteration_bounds = array<i64: 4>, scalar_prefetch = 0 : i64, scratch_operands = 0 : i64, tpu.core_type = #tpu.core_type<tc>, window_params = [{transform_indices = @transform_0, window_bounds = array<i64: 8, 128>}, {pipeline_mode = #tpu.pipeline_mode<synchronous>, transform_indices = @transform_1, window_bounds = array<i64: 128, 512>}, {pipeline_mode = #tpu.pipeline_mode<synchronous>, transform_indices = @transform_2, window_bounds = array<i64: 1, 512>}, {pipeline_mode = #tpu.pipeline_mode<synchronous>, transform_indices = @transform_3, window_bounds = array<i64: 512, 32>}, {pipeline_mode = #tpu.pipeline_mode<synchronous>, transform_indices = @transform_4, window_bounds = array<i64: 1, 32>}, {transform_indices = @transform_5, window_bounds = array<i64: 8, 32>}]} {
    %c0 = arith.constant 0 : index
    %c0_0 = arith.constant 0 : index
    %0 = vector.load %arg1[%c0, %c0_0] : memref<8x128xf32, #tpu.memory_space<vmem>>, vector<8x128xf32>
    %c0_1 = arith.constant 0 : index
    %c0_2 = arith.constant 0 : index
    %1 = vector.load %arg2[%c0_1, %c0_2] : memref<128x512xf32, #tpu.memory_space<vmem>>, vector<128x512xf32>
    %cst = arith.constant dense<0.000000e+00> : vector<8x512xf32>
    %2 = tpu.matmul %0, %1, %cst {dimension_numbers = #tpu.dot_dimension_numbers<[1], [0], [0], [1], [0, 0, 1, 1], [], []>} : vector<8x128xf32>, vector<128x512xf32>, vector<8x512xf32> -> vector<8x512xf32>
    %c0_3 = arith.constant 0 : index
    %c0_4 = arith.constant 0 : index
    %3 = vector.load %arg3[%c0_3, %c0_4] : memref<1x512xf32, #tpu.memory_space<vmem>>, vector<1x512xf32>
    %4 = vector.broadcast %3 : vector<1x512xf32> to vector<8x512xf32>
    %5 = arith.addf %2, %4 : vector<8x512xf32>
    %cst_5 = arith.constant 0.000000e+00 : f32
    %6 = vector.broadcast %cst_5 : f32 to vector<8x512xf32>
    %7 = arith.maximumf %5, %6 : vector<8x512xf32>
    %c0_6 = arith.constant 0 : index
    %c0_7 = arith.constant 0 : index
    %8 = vector.load %arg4[%c0_6, %c0_7] : memref<512x32xf32, #tpu.memory_space<vmem>>, vector<512x32xf32>
    %cst_8 = arith.constant dense<0.000000e+00> : vector<8x32xf32>
    %9 = tpu.matmul %7, %8, %cst_8 {dimension_numbers = #tpu.dot_dimension_numbers<[1], [0], [0], [1], [0, 0, 1, 1], [], []>} : vector<8x512xf32>, vector<512x32xf32>, vector<8x32xf32> -> vector<8x32xf32>
    %c0_9 = arith.constant 0 : index
    %c0_10 = arith.constant 0 : index
    %10 = vector.load %arg5[%c0_9, %c0_10] : memref<1x32xf32, #tpu.memory_space<vmem>>, vector<1x32xf32>
    %11 = vector.broadcast %10 : vector<1x32xf32> to vector<8x32xf32>
    %12 = arith.addf %9, %11 : vector<8x32xf32>
    %c0_11 = arith.constant 0 : index
    %c0_12 = arith.constant 0 : index
    %13 = vector.load %arg6[%c0_11, %c0_12] : memref<8x32xf32, #tpu.memory_space<vmem>>, vector<8x32xf32>
    tpu.vector_store %arg6[%c0_11, %c0_12], %12 {strides = array<i32>} : memref<8x32xf32, #tpu.memory_space<vmem>>, vector<8x32xf32>,
    return
  }
  func.func @transform_0(%arg0: i32) -> (i32, i32) {
    %c0_i32 = arith.constant 0 : i32
    %c0_i32_0 = arith.constant 0 : i32
    return %arg0, %c0_i32 : i32, i32
  }
  func.func @transform_1(%arg0: i32) -> (i32, i32) {
    %c0_i32 = arith.constant 0 : i32
    %c0_i32_0 = arith.constant 0 : i32
    %c0_i32_1 = arith.constant 0 : i32
    return %c0_i32, %c0_i32_0 : i32, i32
  }
  func.func @transform_2(%arg0: i32) -> (i32, i32) {
    %c0_i32 = arith.constant 0 : i32
    %c0_i32_0 = arith.constant 0 : i32
    %c0_i32_1 = arith.constant 0 : i32
    return %c0_i32, %c0_i32_0 : i32, i32
  }
  func.func @transform_3(%arg0: i32) -> (i32, i32) {
    %c0_i32 = arith.constant 0 : i32
    %c0_i32_0 = arith.constant 0 : i32
    %c0_i32_1 = arith.constant 0 : i32
    return %c0_i32, %c0_i32_0 : i32, i32
  }
  func.func @transform_4(%arg0: i32) -> (i32, i32) {
    %c0_i32 = arith.constant 0 : i32
    %c0_i32_0 = arith.constant 0 : i32
    %c0_i32_1 = arith.constant 0 : i32
    return %c0_i32, %c0_i32_0 : i32, i32
  }
  func.func @transform_5(%arg0: i32) -> (i32, i32) {
    %c0_i32 = arith.constant 0 : i32
    %c0_i32_0 = arith.constant 0 : i32
    return %arg0, %c0_i32 : i32, i32
  }
}

</mosaic_0001>

<bundles_post_ra>
// kernel: tpu_custom_call.1
= control target key start
LH: loop header
LB: loop body
LE: loop exit
PB: predicated region body
PF: predicated region fallthrough
CT: control target
= control target key end

     0   :  { %10 = vsyncpa [#allocation3], 0  ;;  %s1436_s0 = inlined_call_operand.vmem [shape: f32[29,128], index: 0, kind: input, shape index: {}]   ;;  %s1437_s1 = inlined_call_operand.vmem [shape: f32[128,512], index: 1, kind: input, shape index: {}]   ;;  %s1438_s2 = inlined_call_operand.vmem [shape: f32[1,512], index: 2, kind: input, shape index: {}]   ;;  %s1439_s3 = inlined_call_operand.vmem [shape: f32[512,32], index: 3, kind: input, shape index: {}]   ;;  %s1440_s4 = inlined_call_operand.vmem [shape: f32[1,32], index: 4, kind: input, shape index: {}]   ;;  %s1441_s5 = inlined_call_operand.hbm [shape: f32[29,32], index: 5, kind: output, shape index: {}]  }
   0x1   :  { %12 = vsyncpa [#allocation3 + $0x1], 0  ;;  %s954_s18 = smov 0   ;;  %s956_s19 = smov 0  }
   0x2   :  { %s958_s20 = smov 0   ;;  %s960_s21 = smov 0  }
   0x3 LB: > { %s975_s22 = sadd.s32 4294967295, %s920_s21   ;;  %s739_s23 = sadd.s32 4294967294, %s920_s21   ;;  %s920_s21 = sphi %s960_s21, %s1447_s21   ;;  %s916_s20 = sphi %s958_s20, %s1446_s20   ;;  %s912_s19 = sphi %s956_s19, %s1445_s19   ;;  %s908_s18 = sphi %s954_s18, %s1444_s18  }
   0x4   : > { %s979_s24 = sadd.s32 1, %s920_s21   ;;  %s135_s25 = sadd.s32 1, %s916_s20 }
   0x5   : > { %s132_s26 = ssub.s32 %s920_s21, %s979_s24  ;;  %p145_p0 = scmp.ne.s32.totalorder %s916_s20, %s912_s19 }
   0x6   : > { %p133_p1 = scmp.eq.s32.totalorder %s132_s26, 0  ;;  %p146_p2 = scmp.eq.s32.totalorder %s975_s22, 3 }
   0x7   : > { %p151_p3 = scmp.ne.s32.totalorder %s912_s19, %s908_s18  ;;  %p152_p4 = scmp.eq.s32.totalorder %s739_s23, 3 }
   0x8   : > { %s990_s27 = scalar_select %p133_p1, %s916_s20, %s135_s25  }
   0x9   : > { %p992_p5 = por %p146_p2, %p145_p0  ;;  %p996_p6 = por %p152_p4, %p151_p3 }
   0xa   : > { %p742_p7 = scmp.ge.s32.totalorder %s920_s21, 1  ;;  %p189_p8 = scmp.lt.s32.totalorder %s920_s21, 5 }
   0xc   : > { %p190_p9 = pnand %p742_p7, %p189_p8 }
   0xd   : > { %p216_p10 = scmp.lt.s32.totalorder (!%p190_p9), %s975_s22, 3  ;;  %s213_s13 = sand.u32 (!%p190_p9), 1, %s912_s19  }
   0xe   : > { %193 = sbr.rel (%p190_p9) target bundleno = 467 (0x1d3), region = 40  ;;  %s743_s14 = sshll.u32 (!%p190_p9), %s213_s13, 3 }
   0xf   : > { %s747_s16 = sshll.u32 (!%p190_p9), %s975_s22, 7  ;;  %s215_s17 = scalar_lea.vmem (!%p190_p9), [#allocation2], %s743_s14 }
  0x10   : > { %s680_s23 = sshll.u32 (!%p190_p9), %s215_s17, 4  ;;  %s667_s8 = scalar_lea.sflag (!%p190_p9), [#allocation3], %s213_s13  ;;  %s681_s23 = int_to_ptr.vmem [resolvable:$true] %s680_s23 }
  0x11   : > { %s860_s9 = scalar_lea.vmem (!%p190_p9), %s681_s23, 128  ;;  %s923_s10 = smov (!%p190_p9), [#allocation2]  }
  0x12   : > { %p861_p11 = scmp.ne.s32.totalorder (!%p190_p9), %s681_s23, %s860_s9 }
  0x13   : > { %v282_v0 = vld [vmem:[%s1437_s1 + $0x1e8] sm:$0xff]  ;;  %v284_v1 = vld [vmem:[%s1437_s1 + $0x1f8] sm:$0xff]  ;;  %v281_v2 = vld [vmem:[%s1437_s1 + $0x1e0] sm:$0xff]  ;;  %s1150_s30 = scalar_select %p216_p10, %s975_s22, 3  ;;  %vm664_vm0 = vcmask 261120  }
  0x14   : > { %307 = vmatprep.subr.mxu0 %v282_v0  ;;  %378 = vmatprep.subr.mxu1 %v284_v1  ;;  %v283_v3 = vld [vmem:[%s1437_s1 + $0x1f0] sm:$0xff]  ;;  %v278_v4 = vld [vmem:[%s1437_s1 + $0x1c8] sm:$0xff]  ;;  %v280_v5 = vld [vmem:[%s1437_s1 + $0x1d8] sm:$0xff]  ;;  %v922_v1 = vmov 0.0   ;;  %p862_p12 = pnand %p861_p11, %p992_p5  ;;  %s864_s22 = sshll.u32 %s923_s10, 4  ;;  %s865_s22 = int_to_ptr.vmem [resolvable:$false] %s864_s22 }
  0x15   : > { %308 = vmatpush1.msra.mxu0 %v281_v2  ;;  %379 = vmatpush1.msra.mxu1 %v283_v3  ;;  %v277_v6 = vld [vmem:[%s1437_s1 + $0x1c0] sm:$0xff]  ;;  %v279_v7 = vld [vmem:[%s1437_s1 + $0x1d0] sm:$0xff]  ;;  %v274_v8 = vld [vmem:[%s1437_s1 + $0x1a8] sm:$0xff]  ;;  %s744_s7 = sshll.u32 %s1150_s30, 3  ;;  %s866_s11 = scalar_lea.vmem %s865_s22, 256 }
  0x16   : > { %309 = vmatprep.subr.mxu0 %v278_v4  ;;  %380 = vmatprep.subr.mxu1 %v280_v5  ;;  %v276_v9 = vld [vmem:[%s1437_s1 + $0x1b8] sm:$0xff]  ;;  %v273_v10 = vld [vmem:[%s1437_s1 + $0x1a0] sm:$0xff]  ;;  %v275_v11 = vld [vmem:[%s1437_s1 + $0x1b0] sm:$0xff]  ;;  %s219_s6 = scalar_lea.vmem %s1436_s0, %s744_s7  ;;  %p863_p13 = pneg %p862_p12 }
  0x17   : > { %310 = vmatpush1.msra.mxu0 %v277_v6  ;;  %381 = vmatpush1.msra.mxu1 %v279_v7  ;;  %v270_v12 = vld [vmem:[%s1437_s1 + $0x188] sm:$0xff]  ;;  %v272_v13 = vld [vmem:[%s1437_s1 + $0x198] sm:$0xff]  ;;  %v269_v14 = vld [vmem:[%s1437_s1 + $0x180] sm:$0xff]  ;;  %p867_p0 = scmp.lt.s32.totalorder %s681_s23, %s865_s22  ;;  %p868_p1 = scmp.lt.s32.totalorder %s866_s11, %s860_s9 }
  0x18   : > { %311 = vmatprep.subr.mxu0 %v274_v8  ;;  %382 = vmatprep.subr.mxu1 %v276_v9  ;;  %v271_v15 = vld [vmem:[%s1437_s1 + $0x190] sm:$0xff]  ;;  %v266_v16 = vld [vmem:[%s1437_s1 + $0x168] sm:$0xff]  ;;  %v268_v17 = vld [vmem:[%s1437_s1 + $0x178] sm:$0xff] }
  0x19   : > { %312 = vmatpush1.msra.mxu0 %v273_v10  ;;  %383 = vmatpush1.msra.mxu1 %v275_v11  ;;  %v265_v18 = vld [vmem:[%s1437_s1 + $0x160] sm:$0xff]  ;;  %v267_v19 = vld [vmem:[%s1437_s1 + $0x170] sm:$0xff]  ;;  %v262_v20 = vld [vmem:[%s1437_s1 + $0x148] sm:$0xff]  ;;  %p869_p2 = por %p868_p1, %p867_p0 }
  0x1a   : > { %313 = vmatprep.subr.mxu0 %v270_v12  ;;  %384 = vmatprep.subr.mxu1 %v272_v13  ;;  %v264_v21 = vld [vmem:[%s1437_s1 + $0x158] sm:$0xff]  ;;  %v261_v22 = vld [vmem:[%s1437_s1 + $0x140] sm:$0xff]  ;;  %v263_v23 = vld [vmem:[%s1437_s1 + $0x150] sm:$0xff] }
  0x1b   : > { %314 = vmatpush1.msra.mxu0 %v269_v14  ;;  %385 = vmatpush1.msra.mxu1 %v271_v15  ;;  %v258_v24 = vld [vmem:[%s1437_s1 + $0x128] sm:$0xff]  ;;  %v260_v25 = vld [vmem:[%s1437_s1 + $0x138] sm:$0xff]  ;;  %v257_v26 = vld [vmem:[%s1437_s1 + $0x120] sm:$0xff]  ;;  %p870_p3 = pnand %p869_p2, %p863_p13 }
  0x1c   : > { %315 = vmatprep.subr.mxu0 %v266_v16  ;;  %386 = vmatprep.subr.mxu1 %v268_v17  ;;  %v259_v27 = vld [vmem:[%s1437_s1 + $0x130] sm:$0xff]  ;;  %v254_v28 = vld [vmem:[%s1437_s1 + $0x108] sm:$0xff]  ;;  %v256_v29 = vld [vmem:[%s1437_s1 + $0x118] sm:$0xff] }
  0x1d   : > { %316 = vmatpush1.msra.mxu0 %v265_v18  ;;  %387 = vmatpush1.msra.mxu1 %v267_v19  ;;  %v253_v30 = vld [vmem:[%s1437_s1 + $0x100] sm:$0xff]  ;;  %v255_v31 = vld [vmem:[%s1437_s1 + $0x110] sm:$0xff]  ;;  %v250_v32 = vld [vmem:[%s1437_s1 + $0xe8] sm:$0xff] }
  0x1e   : > { %317 = vmatprep.subr.mxu0 %v262_v20  ;;  %388 = vmatprep.subr.mxu1 %v264_v21  ;;  %v252_v33 = vld [vmem:[%s1437_s1 + $0xf8] sm:$0xff]  ;;  %v249_v34 = vld [vmem:[%s1437_s1 + $0xe0] sm:$0xff]  ;;  %v251_v35 = vld [vmem:[%s1437_s1 + $0xf0] sm:$0xff] }
  0x1f   : > { %318 = vmatpush1.msra.mxu0 %v261_v22  ;;  %389 = vmatpush1.msra.mxu1 %v263_v23  ;;  %v246_v36 = vld [vmem:[%s1437_s1 + $0xc8] sm:$0xff]  ;;  %v248_v37 = vld [vmem:[%s1437_s1 + $0xd8] sm:$0xff]  ;;  %v245_v38 = vld [vmem:[%s1437_s1 + $0xc0] sm:$0xff] }
  0x20   : > { %319 = vmatprep.subr.mxu0 %v258_v24  ;;  %390 = vmatprep.subr.mxu1 %v260_v25  ;;  %v247_v39 = vld [vmem:[%s1437_s1 + $0xd0] sm:$0xff]  ;;  %v242_v40 = vld [vmem:[%s1437_s1 + $0xa8] sm:$0xff]  ;;  %v244_v41 = vld [vmem:[%s1437_s1 + $0xb8] sm:$0xff] }
  0x21   : > { %320 = vmatpush1.msra.mxu0 %v257_v26  ;;  %391 = vmatpush1.msra.mxu1 %v259_v27  ;;  %v241_v42 = vld [vmem:[%s1437_s1 + $0xa0] sm:$0xff]  ;;  %v243_v43 = vld [vmem:[%s1437_s1 + $0xb0] sm:$0xff]  ;;  %v238_v44 = vld [vmem:[%s1437_s1 + $0x88] sm:$0xff] }
  0x22   : > { %321 = vmatprep.subr.mxu0 %v254_v28  ;;  %392 = vmatprep.subr.mxu1 %v256_v29  ;;  %v240_v45 = vld [vmem:[%s1437_s1 + $0x98] sm:$0xff]  ;;  %v237_v46 = vld [vmem:[%s1437_s1 + $0x80] sm:$0xff]  ;;  %v239_v47 = vld [vmem:[%s1437_s1 + $0x90] sm:$0xff] }
  0x23   : > { %322 = vmatpush1.msra.mxu0 %v253_v30  ;;  %393 = vmatpush1.msra.mxu1 %v255_v31  ;;  %v234_v48 = vld [vmem:[%s1437_s1 + $0x68] sm:$0xff]  ;;  %v236_v49 = vld [vmem:[%s1437_s1 + $0x78] sm:$0xff]  ;;  %v233_v50 = vld [vmem:[%s1437_s1 + $0x60] sm:$0xff] }
  0x24   : > { %323 = vmatprep.subr.mxu0 %v250_v32  ;;  %394 = vmatprep.subr.mxu1 %v252_v33  ;;  %v235_v51 = vld [vmem:[%s1437_s1 + $0x70] sm:$0xff]  ;;  %v230_v52 = vld [vmem:[%s1437_s1 + $0x48] sm:$0xff]  ;;  %v232_v53 = vld [vmem:[%s1437_s1 + $0x58] sm:$0xff] }
  0x25   : > { %324 = vmatpush1.msra.mxu0 %v249_v34  ;;  %395 = vmatpush1.msra.mxu1 %v251_v35  ;;  %v229_v54 = vld [vmem:[%s1437_s1 + $0x40] sm:$0xff]  ;;  %v231_v55 = vld [vmem:[%s1437_s1 + $0x50] sm:$0xff]  ;;  %v226_v56 = vld [vmem:[%s1437_s1 + $0x28] sm:$0xff] }
  0x26   : > { %325 = vmatprep.subr.mxu0 %v246_v36  ;;  %396 = vmatprep.subr.mxu1 %v248_v37  ;;  %v228_v57 = vld [vmem:[%s1437_s1 + $0x38] sm:$0xff]  ;;  %v225_v58 = vld [vmem:[%s1437_s1 + $0x20] sm:$0xff]  ;;  %v227_v59 = vld [vmem:[%s1437_s1 + $0x30] sm:$0xff] }
  0x27   : > { %326 = vmatpush1.msra.mxu0 %v245_v38  ;;  %397 = vmatpush1.msra.mxu1 %v247_v39  ;;  %v222_v60 = vld [vmem:[%s1437_s1 + $0x8] sm:$0xff]  ;;  %v224_v61 = vld [vmem:[%s1437_s1 + $0x18] sm:$0xff]  ;;  %v221_v62 = vld [vmem:[%s1437_s1] sm:$0xff] }
  0x28   : > { %327 = vmatprep.subr.mxu0 %v242_v40  ;;  %398 = vmatprep.subr.mxu1 %v244_v41  ;;  %v223_v63 = vld [vmem:[%s1437_s1 + $0x10] sm:$0xff]  ;;  %v220_v0 = vld [vmem:[%s219_s6] sm:$0xff]  ;;  %v484_v2 = vld [vmem:[%s1439_s3 + $0xf8] sm:$0xff]  ;;  %s678_s6 = scalar_lea.hbm %s1441_s5, %s747_s16 }
  0x29   : > { %328 = vmatpush1.msra.mxu0 %v241_v42  ;;  %399 = vmatpush1.msra.mxu1 %v243_v43  ;;  %v516_v3 = vld [vmem:[%s1439_s3 + $0x1f8] sm:$0xff]  ;;  %v483_v6 = vld [vmem:[%s1439_s3 + $0xf0] sm:$0xff]  ;;  %v482_v10 = vld [vmem:[%s1439_s3 + $0xe8] sm:$0xff] }
  0x2a   : > { %329 = vmatprep.subr.mxu0 %v238_v44  ;;  %400 = vmatprep.subr.mxu1 %v240_v45  ;;  %v468_v4 = vld [vmem:[%s1439_s3 + $0x78] sm:$0xff]  ;;  %v515_v7 = vld [vmem:[%s1439_s3 + $0x1f0] sm:$0xff]  ;;  %v514_v11 = vld [vmem:[%s1439_s3 + $0x1e8] sm:$0xff] }
  0x2b   : > { %330 = vmatpush1.msra.mxu0 %v237_v46  ;;  %401 = vmatpush1.msra.mxu1 %v239_v47  ;;  %v500_v5 = vld [vmem:[%s1439_s3 + $0x178] sm:$0xff]  ;;  %v467_v8 = vld [vmem:[%s1439_s3 + $0x70] sm:$0xff]  ;;  %v466_v12 = vld [vmem:[%s1439_s3 + $0x68] sm:$0xff] }
  0x2c   : > { %331 = vmatprep.subr.mxu0 %v234_v48  ;;  %402 = vmatprep.subr.mxu1 %v236_v49  ;;  %v499_v9 = vld [vmem:[%s1439_s3 + $0x170] sm:$0xff]  ;;  %v498_v13 = vld [vmem:[%s1439_s3 + $0x168] sm:$0xff]  ;;  %v481_v14 = vld [vmem:[%s1439_s3 + $0xe0] sm:$0xff] }
  0x2d   : > { %332 = vmatpush1.msra.mxu0 %v233_v50  ;;  %403 = vmatpush1.msra.mxu1 %v235_v51  ;;  %v513_v15 = vld [vmem:[%s1439_s3 + $0x1e0] sm:$0xff]  ;;  %v480_v18 = vld [vmem:[%s1439_s3 + $0xd8] sm:$0xff]  ;;  %v479_v22 = vld [vmem:[%s1439_s3 + $0xd0] sm:$0xff] }
  0x2e   : > { %333 = vmatprep.subr.mxu0 %v230_v52  ;;  %404 = vmatprep.subr.mxu1 %v232_v53  ;;  %v465_v16 = vld [vmem:[%s1439_s3 + $0x60] sm:$0xff]  ;;  %v512_v19 = vld [vmem:[%s1439_s3 + $0x1d8] sm:$0xff]  ;;  %v511_v23 = vld [vmem:[%s1439_s3 + $0x1d0] sm:$0xff] }
  0x2f   : > { %334 = vmatpush1.msra.mxu0 %v229_v54  ;;  %405 = vmatpush1.msra.mxu1 %v231_v55  ;;  %v497_v17 = vld [vmem:[%s1439_s3 + $0x160] sm:$0xff]  ;;  %v464_v20 = vld [vmem:[%s1439_s3 + $0x58] sm:$0xff]  ;;  %v463_v24 = vld [vmem:[%s1439_s3 + $0x50] sm:$0xff] }
  0x30   : > { %335 = vmatprep.subr.mxu0 %v226_v56  ;;  %406 = vmatprep.subr.mxu1 %v228_v57  ;;  %v496_v21 = vld [vmem:[%s1439_s3 + $0x158] sm:$0xff]  ;;  %v495_v25 = vld [vmem:[%s1439_s3 + $0x150] sm:$0xff]  ;;  %v478_v26 = vld [vmem:[%s1439_s3 + $0xc8] sm:$0xff] }
  0x31   : > { %336 = vmatpush1.msra.mxu0 %v225_v58  ;;  %407 = vmatpush1.msra.mxu1 %v227_v59  ;;  %v510_v27 = vld [vmem:[%s1439_s3 + $0x1c8] sm:$0xff]  ;;  %v477_v30 = vld [vmem:[%s1439_s3 + $0xc0] sm:$0xff]  ;;  %v476_v34 = vld [vmem:[%s1439_s3 + $0xb8] sm:$0xff] }
  0x32   : > { %337 = vmatprep.subr.mxu0 %v222_v60  ;;  %408 = vmatprep.subr.mxu1 %v224_v61  ;;  %v462_v28 = vld [vmem:[%s1439_s3 + $0x48] sm:$0xff]  ;;  %v509_v31 = vld [vmem:[%s1439_s3 + $0x1c0] sm:$0xff]  ;;  %v508_v35 = vld [vmem:[%s1439_s3 + $0x1b8] sm:$0xff] }
  0x33   : > { %338 = vmatpush1.msra.mxu0 %v221_v62  ;;  %371 = vmatprep.mubr.f32.mxu0 %v922_v1  ;;  %v494_v29 = vld [vmem:[%s1439_s3 + $0x148] sm:$0xff]  ;;  %v461_v32 = vld [vmem:[%s1439_s3 + $0x40] sm:$0xff]  ;;  %v460_v36 = vld [vmem:[%s1439_s3 + $0x38] sm:$0xff] }
  0x34   : > { %409 = vmatpush1.msra.mxu1 %v223_v63  ;;  %442 = vmatprep.mubr.f32.mxu1 %v922_v1  ;;  %v493_v33 = vld [vmem:[%s1439_s3 + $0x140] sm:$0xff]  ;;  %v492_v37 = vld [vmem:[%s1439_s3 + $0x138] sm:$0xff]  ;;  %v475_v38 = vld [vmem:[%s1439_s3 + $0xb0] sm:$0xff] }
  0x35   : > { %372 = vmatmul.mubr.f32.vlgmr.msra.gmra.mxu0 %v220_v0  ;;  %443 = vmatmul.mubr.f32.vlgmr.msra.gmra.mxu1 %v220_v0  ;;  %v507_v39 = vld [vmem:[%s1439_s3 + $0x1b0] sm:$0xff]  ;;  %v474_v42 = vld [vmem:[%s1439_s3 + $0xa8] sm:$0xff]  ;;  %v473_v46 = vld [vmem:[%s1439_s3 + $0xa0] sm:$0xff] }
  0x36   : > { %750 = vmatprep.subr.mxu0 %v484_v2  ;;  %785 = vmatprep.subr.mxu1 %v516_v3  ;;  %v459_v40 = vld [vmem:[%s1439_s3 + $0x30] sm:$0xff]  ;;  %v506_v43 = vld [vmem:[%s1439_s3 + $0x1a8] sm:$0xff]  ;;  %v505_v47 = vld [vmem:[%s1439_s3 + $0x1a0] sm:$0xff]  ;;  %v287_v2 = vlaneseq }
  0x37   : > { %751 = vmatpush3.msra.mxu0 %v468_v4  ;;  %786 = vmatpush3.msra.mxu1 %v500_v5  ;;  %v491_v41 = vld [vmem:[%s1439_s3 + $0x130] sm:$0xff]  ;;  %v458_v44 = vld [vmem:[%s1439_s3 + $0x28] sm:$0xff]  ;;  %v457_v48 = vld [vmem:[%s1439_s3 + $0x20] sm:$0xff] }
  0x38   : > { %752 = vmatprep.subr.mxu0 %v483_v6  ;;  %787 = vmatprep.subr.mxu1 %v515_v7  ;;  %v490_v45 = vld [vmem:[%s1439_s3 + $0x128] sm:$0xff]  ;;  %v489_v49 = vld [vmem:[%s1439_s3 + $0x120] sm:$0xff]  ;;  %v472_v50 = vld [vmem:[%s1439_s3 + $0x98] sm:$0xff]  ;;  %v288_v3 = vshrl.u32 %v287_v2, 7 }
  0x39   : > { %753 = vmatpush3.msra.mxu0 %v467_v8  ;;  %788 = vmatpush3.msra.mxu1 %v499_v9  ;;  %v504_v51 = vld [vmem:[%s1439_s3 + $0x198] sm:$0xff]  ;;  %v471_v54 = vld [vmem:[%s1439_s3 + $0x90] sm:$0xff]  ;;  %v470_v58 = vld [vmem:[%s1439_s3 + $0x88] sm:$0xff] }
  0x3a   : > { %754 = vmatprep.subr.mxu0 %v482_v10  ;;  %789 = vmatprep.subr.mxu1 %v514_v11  ;;  %v456_v52 = vld [vmem:[%s1439_s3 + $0x18] sm:$0xff]  ;;  %v503_v55 = vld [vmem:[%s1439_s3 + $0x190] sm:$0xff]  ;;  %v502_v59 = vld [vmem:[%s1439_s3 + $0x188] sm:$0xff]  ;;  %v297_v4 = vsub.s32 2, %v288_v3  ;;  %v289_v5 = vsub.s32 0, %v288_v3  ;;  %v293_v7 = vsub.s32 1, %v288_v3 }
  0x3b   : > { %755 = vmatpush3.msra.mxu0 %v466_v12  ;;  %790 = vmatpush3.msra.mxu1 %v498_v13  ;;  %v488_v53 = vld [vmem:[%s1439_s3 + $0x118] sm:$0xff]  ;;  %v455_v56 = vld [vmem:[%s1439_s3 + $0x10] sm:$0xff]  ;;  %v454_v60 = vld [vmem:[%s1439_s3 + $0x8] sm:$0xff]  ;;  %v301_v8 = vsub.s32 3, %v288_v3 }
  0x3c   : > { %756 = vmatprep.subr.mxu0 %v481_v14  ;;  %791 = vmatprep.subr.mxu1 %v513_v15  ;;  %v487_v57 = vld [vmem:[%s1439_s3 + $0x110] sm:$0xff]  ;;  %v486_v61 = vld [vmem:[%s1439_s3 + $0x108] sm:$0xff]  ;;  %v469_v62 = vld [vmem:[%s1439_s3 + $0x80] sm:$0xff] }
  0x3d   : > { %757 = vmatpush3.msra.mxu0 %v465_v16  ;;  %792 = vmatpush3.msra.mxu1 %v497_v17  ;;  %v501_v63 = vld [vmem:[%s1439_s3 + $0x180] sm:$0xff] }
  0x3e   : > { %758 = vmatprep.subr.mxu0 %v480_v18  ;;  %793 = vmatprep.subr.mxu1 %v512_v19  ;;  %v453_v0 = vld [vmem:[%s1439_s3] sm:$0xff] }
  0x3f   : > { %759 = vmatpush3.msra.mxu0 %v464_v20  ;;  %794 = vmatpush3.msra.mxu1 %v496_v21  ;;  %v485_v1 = vld [vmem:[%s1439_s3 + $0x100] sm:$0xff] }
  0x40   : > { %760 = vmatprep.subr.mxu0 %v479_v22  ;;  %795 = vmatprep.subr.mxu1 %v511_v23  ;;  %v285_v6 = vld [vmem:[%s1438_s2] sm:$0xf] }
  0x41   : > { %761 = vmatpush3.msra.mxu0 %v463_v24  ;;  %796 = vmatpush3.msra.mxu1 %v495_v25  ;;  %v298_v9 = vrot.slane %v285_v6, %v297_v4  ;;  %v290_v10 = vrot.slane %v285_v6, %v289_v5  ;;  %v294_v11 = vrot.slane %v285_v6, %v293_v7 }
  0x42   : > { %762 = vmatprep.subr.mxu0 %v478_v26  ;;  %797 = vmatprep.subr.mxu1 %v510_v27  ;;  %v302_v12 = vrot.slane %v285_v6, %v301_v8  ;;  %v745_v27 = vld [vmem:[%s1440_s4] ss:$0 sm:$0xff] }
  0x43   : > { %763 = vmatpush3.msra.mxu0 %v462_v28  ;;  %798 = vmatpush3.msra.mxu1 %v494_v29 }
  0x44   : > { %764 = vmatprep.subr.mxu0 %v477_v30  ;;  %799 = vmatprep.subr.mxu1 %v509_v31 }
  0x45   : > { %765 = vmatpush3.msra.mxu0 %v461_v32  ;;  %800 = vmatpush3.msra.mxu1 %v493_v33 }
  0x46   : > { %766 = vmatprep.subr.mxu0 %v476_v34  ;;  %801 = vmatprep.subr.mxu1 %v508_v35 }
  0x47   : > { %767 = vmatpush3.msra.mxu0 %v460_v36  ;;  %802 = vmatpush3.msra.mxu1 %v492_v37 }
  0x48   : > { %768 = vmatprep.subr.mxu0 %v475_v38  ;;  %803 = vmatprep.subr.mxu1 %v507_v39 }
  0x49   : > { %769 = vmatpush3.msra.mxu0 %v459_v40  ;;  %804 = vmatpush3.msra.mxu1 %v491_v41 }
  0x4a   : > { %770 = vmatprep.subr.mxu0 %v474_v42  ;;  %805 = vmatprep.subr.mxu1 %v506_v43 }
  0x4b   : > { %771 = vmatpush3.msra.mxu0 %v458_v44  ;;  %806 = vmatpush3.msra.mxu1 %v490_v45 }
  0x4c   : > { %772 = vmatprep.subr.mxu0 %v473_v46  ;;  %807 = vmatprep.subr.mxu1 %v505_v47 }
  0x4d   : > { %773 = vmatpush3.msra.mxu0 %v457_v48  ;;  %808 = vmatpush3.msra.mxu1 %v489_v49 }
  0x4e   : > { %774 = vmatprep.subr.mxu0 %v472_v50  ;;  %809 = vmatprep.subr.mxu1 %v504_v51 }
  0x4f   : > { %775 = vmatpush3.msra.mxu0 %v456_v52  ;;  %810 = vmatpush3.msra.mxu1 %v488_v53 }
  0x50   : > { %776 = vmatprep.subr.mxu0 %v471_v54  ;;  %811 = vmatprep.subr.mxu1 %v503_v55 }
  0x51   : > { %777 = vmatpush3.msra.mxu0 %v455_v56  ;;  %812 = vmatpush3.msra.mxu1 %v487_v57 }
  0x52   : > { %778 = vmatprep.subr.mxu0 %v470_v58  ;;  %813 = vmatprep.subr.mxu1 %v502_v59 }
  0x53   : > { %779 = vmatpush3.msra.mxu0 %v454_v60  ;;  %814 = vmatpush3.msra.mxu1 %v486_v61 }
  0x54   : > { %780 = vmatprep.subr.mxu0 %v469_v62  ;;  %815 = vmatprep.subr.mxu1 %v501_v63 }
  0x55   : > { %781 = vmatpush3.msra.mxu0 %v453_v0  ;;  %816 = vmatpush3.msra.mxu1 %v485_v1 }
  0xf5   : > { %v373_v13 = vpop.f32.mrf.mxu0  ;;  %v444_v14 = vpop.f32.mrf.mxu1 }
  0xf6   : > { %v445_v15 = vadd.f32 %v444_v14, %v298_v9  ;;  %v374_v16 = vadd.f32 %v373_v13, %v290_v10 }
  0xf7   : > { %v375_v17 = vpop.f32.mrf.mxu0  ;;  %v446_v18 = vpop.f32.mrf.mxu1 }
  0xf8   : > { %v376_v19 = vadd.f32 %v375_v17, %v294_v11  ;;  %v447_v20 = vadd.f32 %v446_v18, %v302_v12  ;;  %v451_v21 = vmax.f32 %v445_v15, 0.0  ;;  %v449_v24 = vmax.f32 %v374_v16, 0.0 }
  0xfa   : > { %v450_v22 = vmax.f32 %v376_v19, 0.0  ;;  %v452_v23 = vmax.f32 %v447_v20, 0.0 }
  0xfc   : > { %588 = vmatprep.mubr.f32.mxu0 %v450_v22  ;;  %658 = vmatprep.mubr.f32.mxu1 %v452_v23 }
  0xfd   : > { %589 = vmatmul.mubr.f32.vlgmr.msra.gmra.mxu0 %v449_v24  ;;  %659 = vmatmul.mubr.f32.vlgmr.msra.gmra.mxu1 %v451_v21 }
 0x1bd   : > { %v782_v25 = vpop.f32.mrf.mxu0  ;;  %v817_v26 = vpop.f32.mrf.mxu1 }
 0x1bf   : > { %v783_v28 = vpop.f32.mrf.mxu0  ;;  %v818_v29 = vpop.f32.mrf.mxu1 }
 0x1c0   : > { %v784_v30 = vadd.f32 %v783_v28, %v782_v25  ;;  %v819_v32 = vadd.f32 %v818_v29, %v817_v26 }
 0x1c2   : > { %v591_v31 = vadd.f32 %v784_v30, %v745_v27 }
 0x1c4   : > { %v661_v33 = vadd.f32 %v819_v32, %v591_v31 }
 0x1c6   : > { %665 = vst.msk [vmem:[%s215_s17] sm:$0xff] %vm664_vm0, %v661_v33 }
 0x1c7   : > { %873 = shalt.err (!%p870_p3)
}
 0x1c8   : > { %s874_s12 = scalar_lea.hbm %s678_s6, 128  ;;  %s878_s14 = scalar_lea.hbm %s1441_s5, 512 }
 0x1c9   : > { %p875_p4 = scmp.ne.s32.totalorder %s678_s6, %s874_s12  ;;  %p879_p9 = scmp.lt.s32.totalorder %s678_s6, %s1441_s5 }
 0x1ca   : > { %p880_p10 = scmp.lt.s32.totalorder %s878_s14, %s874_s12 }
 0x1cb   : > { %p876_p7 = pnand %p875_p4, %p992_p5 }
 0x1cc   : > { %p881_p11 = por %p880_p10, %p879_p9 }
 0x1cd   : > { %p877_p8 = pneg %p876_p7 }
 0x1cf   : > { %p882_p12 = pnand %p881_p11, %p877_p8 }
 0x1d1   : > { %885 = shalt.err (!%p882_p12)
}
 0x1d2   : > { %820 = dma.vmem_to_hbm [thread:$0]  (%p992_p5), %s681_s23, 128, %s678_s6, %s667_s8  }
 0x1d3 PF: > { %p826_p13 = scmp.ge.s32.totalorder %s920_s21, 2  ;;  %s692_s16 = sand.u32 1, %s908_s18  }
 0x1d4   : > { %s693_s17 = scalar_lea.sflag [#allocation3], %s692_s16 }
 0x1d5   : > { %p823_p0 = pnand %p826_p13, %p996_p6 }
 0x1d7   : > { %p824_p1 = pneg %p823_p0 }
 0x1d9   : > { %903 = dma.done.wait (%p824_p1), %s693_s17, 128  }
 0x1da   : > { %905 = vsyncadd (%p824_p1), %s693_s17, 4294967168  ;;  %p15_p2 = scmp.ge.s32.totalorder %s979_s24, 6   ;;  %s1444_s18 = smov %s912_s19 }
 0x1db   : > { %s1445_s19 = smov %s916_s20  ;;  %s1446_s20 = smov %s990_s27 }
 0x1dc   : > { %s1447_s21 = smov %s979_s24  ;;  %17 = sbr.rel (!%p15_p2) target bundleno = 3 (0x3), region = 75 }
 0x1e1   :  { %698 = vsyncpa [#allocation3], 1 }
 0x1e2   :  { %700 = vsyncpa [#allocation3 + $0x1], 1 }

</bundles_post_ra>
